<compile_context>
chip_gen: v5e
topology: v5e:2x2
jax: 0.10.0
libtpu: 0.0.40
codegen_flags: <defaults>
</compile_context>

<pallas_src>
import numpy as np
import jax
import jax.numpy as jnp
from jax.experimental import pallas as pl
from jax.experimental.pallas import tpu as pltpu

# ----------------------------- configuration -------------------------------
N_S, N_W, N_N = 12, 6, 10          # wave / wait / neighbor feature sizes
N_A = 4                            # actions (module hard-codes pi_out[:, :4])
N_FC = 128                         # n_fc_wave = n_fc_wait = n_fc_neighbor = 128
N_LSTM = 64
DRU_SIGMA = 2.0                    # DRU(2, True, False) -> sigma = 2
B = 1                              # 'pv' path assumes batch == 1

OBS_DIM = N_S + N_W + N_N          # 28
MSG_COL = OBS_DIM                  # 28  (message packed after obs)
NOISE_COL = OBS_DIM + 1            # 29  (DRU noise packed after message)
F_IN = 32                          # front-end K, padded to 32 (rows 29..31 are 0)
F_OUT = 6 * N_FC                   # 768 = x0_p|x1_p|m_p|x0_v|x1_v|x2_v
GH = 4 * N_LSTM                    # 256 gate width per LSTM cell (i|f|g|o)
L_PI = N_FC + N_LSTM               # 192 = [x_p | h_pi]
L_V = 3 * N_FC + N_LSTM            # 448 = [x_v | h_v]
L_IN = L_PI + L_V                  # 640 rows of the dense LSTM weight stack


# ------------------------------ Pallas kernel ------------------------------
def _lstm_ac_policy_kernel(data_ref, wf_ref, wl_ref, wh_ref, bias_ref, out_ref):
    f32, bf16 = jnp.float32, jnp.bfloat16

    obs_row = data_ref[0:1, :]                       # [1,128]: obs(28)|msg|noise|0
    h = data_ref[1:2, :]                             # [1,128]: [h_pi | h_v]
    c = data_ref[2:3, :]                             # [1,128]: [c_pi | c_v]
    noise = obs_row[:, NOISE_COL:NOISE_COL + 1]      # [1,1]

    b_front = bias_ref[0:1, :]                       # [1,768]
    b_lstm_pi = bias_ref[1:2, 0:GH]                  # [1,256]
    b_lstm_v = bias_ref[1:2, GH:2 * GH]              # [1,256]
    b_pi1 = bias_ref[1:2, 2 * GH:2 * GH + N_LSTM]    # [1,64]
    b_head = bias_ref[1:2, 5 * N_FC:6 * N_FC]        # [1,128]

    # Front end (fc0_pi|fc1_pi|message_mlp|fc0_v|fc1_v|fc2_v) fused into one dot.
    # WF rows 29..31 are zero, so the noise lane inside obs_row[:, :32] is inert.
    front = jnp.dot(obs_row[:, 0:F_IN].astype(bf16), wf_ref[...],
                    preferred_element_type=f32) + b_front
    front = jnp.maximum(front, 0.0)                              # [1,768]

    x_p = front[:, 0:N_FC] + front[:, N_FC:2 * N_FC] + front[:, 2 * N_FC:3 * N_FC]

    # Dense (zero-free) LSTM weight stack: rows 0:192 drive lstm_pi, 192:640 lstm_v.
    xh_pi = jnp.concatenate([x_p, h[:, 0:N_LSTM]], axis=1)                      # [1,192]
    xh_v = jnp.concatenate([front[:, 3 * N_FC:6 * N_FC],
                            h[:, N_LSTM:2 * N_LSTM]], axis=1)                   # [1,448]
    gp = jnp.dot(xh_pi.astype(bf16), wl_ref[0:L_PI, :],
                 preferred_element_type=f32) + b_lstm_pi                        # [1,256]
    gv = jnp.dot(xh_v.astype(bf16), wl_ref[L_PI:L_IN, :],
                 preferred_element_type=f32) + b_lstm_v                         # [1,256]

    def gate(k):     # [gate_pi | gate_v] -> 128 lanes, matches [c_pi | c_v] packing
        return jnp.concatenate([gp[:, k * N_LSTM:(k + 1) * N_LSTM],
                                gv[:, k * N_LSTM:(k + 1) * N_LSTM]], axis=1)

    i_g = jax.nn.sigmoid(gate(0))
    f_g = jax.nn.sigmoid(gate(1))
    g_g = jnp.tanh(gate(2))
    o_g = jax.nn.sigmoid(gate(3))
    c_new = f_g * c + i_g * g_g                                  # [c_pi | c_v]
    h_new = o_g * jnp.tanh(c_new)                                # [h_pi | h_v]

    # pi_mlp hidden layer (w_pi1 zero-padded so the h_v half contributes 0).
    z = jnp.maximum(
        jnp.dot(h_new.astype(bf16), wh_ref[:, 0:N_LSTM],
                preferred_element_type=f32) + b_pi1, 0.0)        # [1,64]

    # Fused output head: [z | h_v] @ [w_pi2 | w_v] -> pi_full (cols 0:5), v (col 5).
    head_in = jnp.concatenate([z, h_new[:, N_LSTM:2 * N_LSTM]], axis=1)
    head = jnp.dot(head_in.astype(bf16), wh_ref[:, 128:256],
                   preferred_element_type=f32) + b_head          # [1,128]

    # TODO(synk): DRU class source not provided; implementing the standard DIAL
    # DRU train-mode regularizer: sigmoid(m + N(0,1) * sigma), noise passed in.
    msg_out = jax.nn.sigmoid(head[:, N_A:N_A + 1] + noise * DRU_SIGMA)

    extras = jnp.concatenate(
        [head[:, 0:N_A],                # pi
         head[:, N_A + 1:N_A + 2],      # v
         msg_out,                       # new message
         jnp.zeros((1, 128 - (N_A + 2)), f32)], axis=1)          # [1,128]

    # Single lane-dense store: row0 = [h_pi|h_v], row1 = [c_pi|c_v], row2 = extras.
    out_ref[...] = jnp.concatenate([h_new, c_new, extras], axis=0)  # (3,128)


# ------------------------------ wrapper (glue) ------------------------------
@jax.jit
def lstm_ac_policy_forward(obs, hidden, message, noise, packed):
    """obs: [B, 28], hidden: [B, 2, 128], message/noise: [B, 1], packed: weight slabs."""
    pad = jnp.zeros((obs.shape[0], 128 - (OBS_DIM + 2)), jnp.float32)
    row0 = jnp.concatenate([obs, message, noise, pad], axis=1)                  # [1,128]
    h_fused = jnp.concatenate([hidden[:, 0, :N_LSTM], hidden[:, 1, :N_LSTM]], 1)
    c_fused = jnp.concatenate([hidden[:, 0, N_LSTM:], hidden[:, 1, N_LSTM:]], 1)
    data = jnp.concatenate([row0, h_fused, c_fused], axis=0)                    # (3,128)

    vmem = lambda: pl.BlockSpec(memory_space=pltpu.MemorySpace.VMEM)
    out = pl.pallas_call(
        _lstm_ac_policy_kernel,
        out_shape=jax.ShapeDtypeStruct((3, 128), jnp.float32),
        in_specs=[vmem() for _ in range(5)],
        out_specs=vmem(),
    )(data, packed["wf"], packed["wl"], packed["wh"], packed["bias"])

    h_new, c_new, extras = out[0:1, :], out[1:2, :], out[2:3, :]
    pi = extras[:, 0:N_A]
    v = extras[:, N_A:N_A + 1]
    msg_out = extras[:, N_A + 1:N_A + 2]
    # torch layout: row0 = [h_pi|c_pi], row1 = [h_v|c_v]
    new_hidden = jnp.concatenate(
        [jnp.concatenate([h_new[:, :N_LSTM], c_new[:, :N_LSTM]], axis=1),
         jnp.concatenate([h_new[:, N_LSTM:], c_new[:, N_LSTM:]], axis=1)], axis=0)
    return pi, v, new_hidden, msg_out


# ------------------------- parameter packing (host) -------------------------
def pack_params(p):
    """Fuse the unfused torch-style params into the kernel's packed slabs."""
    g = lambda k: np.asarray(p[k], np.float32)

    # front-end slab: [32, 768], block-diagonal over the obs row.
    wf = np.zeros((F_IN, F_OUT), np.float32)
    wf[0:N_S, 0:128] = g("w_fc0_pi")
    wf[N_S:N_S + N_W, 128:256] = g("w_fc1_pi")
    wf[MSG_COL, 256:384] = g("w_msg")[0]
    wf[0:N_S, 384:512] = g("w_fc0_v")
    wf[N_S:N_S + N_W, 512:640] = g("w_fc1_v")
    wf[N_S + N_W:OBS_DIM, 640:768] = g("w_fc2_v")
    b_front = np.zeros((F_OUT,), np.float32)
    for k, name in enumerate(["b_fc0_pi", "b_fc1_pi", "b_msg",
                              "b_fc0_v", "b_fc1_v", "b_fc2_v"]):
        b_front[k * 128:(k + 1) * 128] = g(name)[0]

    # dense LSTM slab: [640, 256] = rows [wih_pi | whh_pi | wih_v | whh_v],
    # columns in native torch gate order i|f|g|o (64 each).  Zero-free.
    wl = np.zeros((L_IN, GH), np.float32)
    wl[0:N_FC, :] = g("wih_pi")                 # (128, 256)
    wl[N_FC:L_PI, :] = g("whh_pi")              # (64, 256)
    wl[L_PI:L_PI + 3 * N_FC, :] = g("wih_v")    # (384, 256)
    wl[L_PI + 3 * N_FC:L_IN, :] = g("whh_v")    # (64, 256)

    # head slab: cols 0:64 = w_pi1 (padded over h_v rows), cols 128:256 = [w_pi2|w_v].
    wh = np.zeros((128, 256), np.float32)
    wh[0:N_LSTM, 0:N_LSTM] = g("w_pi1")
    wh[0:N_LSTM, 128:128 + N_A + 1] = g("w_pi2")
    wh[N_LSTM:128, 128 + N_A + 1:128 + N_A + 2] = g("w_v").T
    b_head = np.zeros((128,), np.float32)
    b_head[0:N_A + 1] = g("b_pi2")[0]
    b_head[N_A + 1] = g("b_v")[0, 0]

    bias = np.zeros((2, F_OUT), np.float32)
    bias[0] = b_front
    bias[1, 0:GH] = (g("bih_pi") + g("bhh_pi"))[0]
    bias[1, GH:2 * GH] = (g("bih_v") + g("bhh_v"))[0]
    bias[1, 2 * GH:2 * GH + N_LSTM] = g("b_pi1")[0]
    bias[1, 5 * N_FC:6 * N_FC] = b_head

    return {"wf": jnp.asarray(wf, jnp.bfloat16),
            "wl": jnp.asarray(wl, jnp.bfloat16),
            "wh": jnp.asarray(wh, jnp.bfloat16),
            "bias": jnp.asarray(bias, jnp.float32)}


# --------------------------- deterministic params ---------------------------
def ortho_weights(shape, scale, rng):
    """numpy port of baselines ortho_init (2-D case) with explicit RNG."""
    shape = tuple(shape)
    flat_shape = (shape[1], shape[0])
    a = rng.normal(0.0, 1.0, flat_shape)
    u, _, v = np.linalg.svd(a, full_matrices=False)
    q = u if u.shape == flat_shape else v
    q = q.transpose().copy().reshape(shape)
    return (scale * q).astype(np.float32)


def init_params(rng):
    p = {}

    def linear(name, in_f, out_f, scale=np.sqrt(2.0)):
        w = ortho_weights((out_f, in_f), scale, rng)      # torch layout [out, in]
        p["w_" + name] = jnp.asarray(w.T)                 # kernel layout [in, out]
        p["b_" + name] = jnp.zeros((1, out_f), jnp.float32)

    linear("fc0_pi", N_S, N_FC)
    linear("fc1_pi", N_W, N_FC)
    linear("fc0_v", N_S, N_FC)
    linear("fc1_v", N_W, N_FC)
    linear("fc2_v", N_N, N_FC)

    # message_mlp: Linear(1, 128) -> stored as row vector [1, 128]
    w_msg = ortho_weights((128, 1), np.sqrt(2.0), rng)
    p["w_msg"] = jnp.asarray(w_msg.T)
    p["b_msg"] = jnp.zeros((1, 128), jnp.float32)

    # lstm_pi (input 128) and lstm_v (input 384); ortho scale 1.0, zero biases
    p["wih_pi"] = jnp.asarray(ortho_weights((4 * N_LSTM, N_FC), 1.0, rng).T)
    p["whh_pi"] = jnp.asarray(ortho_weights((4 * N_LSTM, N_LSTM), 1.0, rng).T)
    p["bih_pi"] = jnp.zeros((1, 4 * N_LSTM), jnp.float32)
    p["bhh_pi"] = jnp.zeros((1, 4 * N_LSTM), jnp.float32)

    p["wih_v"] = jnp.asarray(ortho_weights((4 * N_LSTM, 3 * N_FC), 1.0, rng).T)
    p["whh_v"] = jnp.asarray(ortho_weights((4 * N_LSTM, N_LSTM), 1.0, rng).T)
    p["bih_v"] = jnp.zeros((1, 4 * N_LSTM), jnp.float32)
    p["bhh_v"] = jnp.zeros((1, 4 * N_LSTM), jnp.float32)

    # pi_mlp: Linear(64,64)+ReLU then Linear(64, n_a+1) with scale 0.01
    linear("pi1", N_LSTM, N_LSTM)
    w_pi2 = ortho_weights((N_A + 1, N_LSTM), 0.01, rng)
    p["w_pi2"] = jnp.asarray(w_pi2.T)
    p["b_pi2"] = jnp.zeros((1, N_A + 1), jnp.float32)

    # v_mlp: Linear(64, 1), kept in torch layout [1, 64] (row vector)
    p["w_v"] = jnp.asarray(ortho_weights((1, N_LSTM), np.sqrt(2.0), rng))
    p["b_v"] = jnp.zeros((1, 1), jnp.float32)
    return p


# ------------------------- float64 numpy reference --------------------------
def reference_forward(obs, hidden, message, noise, p):
    g = lambda x: np.asarray(x, np.float64)
    relu = lambda x: np.maximum(x, 0.0)
    sig = lambda x: 1.0 / (1.0 + np.exp(-x))
    obs, hidden, message, noise = g(obs), g(hidden), g(message), g(noise)
    wave, wait, neigh = obs[:, :N_S], obs[:, N_S:N_S + N_W], obs[:, N_S + N_W:]

    def lstm(x, h, c, wih, whh, bih, bhh):
        gates = x @ g(wih) + g(bih) + h @ g(whh) + g(bhh)
        i, f = sig(gates[:, :N_LSTM]), sig(gates[:, N_LSTM:2 * N_LSTM])
        gg, o = np.tanh(gates[:, 2 * N_LSTM:3 * N_LSTM]), sig(gates[:, 3 * N_LSTM:])
        c2 = f * c + i * gg
        return o * np.tanh(c2), c2

    x0_p = relu(wave @ g(p["w_fc0_pi"]) + g(p["b_fc0_pi"]))
    x1_p = relu(wait @ g(p["w_fc1_pi"]) + g(p["b_fc1_pi"]))
    m_p = relu(message @ g(p["w_msg"]) + g(p["b_msg"]))
    x_p = x0_p + x1_p + m_p
    h_pi, c_pi = lstm(x_p, hidden[:, 0, :N_LSTM], hidden[:, 0, N_LSTM:],
                      p["wih_pi"], p["whh_pi"], p["bih_pi"], p["bhh_pi"])
    z = relu(h_pi @ g(p["w_pi1"]) + g(p["b_pi1"]))
    pi_full = z @ g(p["w_pi2"]) + g(p["b_pi2"])
    pi = pi_full[:, :N_A]

    x0_v = relu(wave @ g(p["w_fc0_v"]) + g(p["b_fc0_v"]))
    x1_v = relu(wait @ g(p["w_fc1_v"]) + g(p["b_fc1_v"]))
    x2_v = relu(neigh @ g(p["w_fc2_v"]) + g(p["b_fc2_v"]))
    x_v = np.concatenate([x0_v, x1_v, x2_v], axis=1)
    h_v, c_v = lstm(x_v, hidden[:, 1, :N_LSTM], hidden[:, 1, N_LSTM:],
                    p["wih_v"], p["whh_v"], p["bih_v"], p["bhh_v"])
    v = h_v @ g(p["w_v"]).T + g(p["b_v"])

    new_hid = np.concatenate([np.concatenate([h_pi, c_pi], 1),
                              np.concatenate([h_v, c_v], 1)], 0)
    msg_out = sig(pi_full[:, N_A:N_A + 1] + noise * DRU_SIGMA)
    return pi, v, new_hid, msg_out


# ----------------------------------- main -----------------------------------
if __name__ == "__main__":
    np_rng = np.random.RandomState(0)
    params = init_params(np_rng)
    packed = pack_params(params)

    key = jax.random.PRNGKey(0)
    k_obs, k_hid, k_msg, k_noise = jax.random.split(key, 4)
    obs = jax.random.normal(k_obs, (B, OBS_DIM), jnp.float32)
    hidden = 0.5 * jax.random.normal(k_hid, (B, 2, 2 * N_LSTM), jnp.float32)
    message = jax.random.normal(k_msg, (B, 1), jnp.float32)
    noise = jax.random.normal(k_noise, (B, 1), jnp.float32)   # DRU noise

    pi, v, new_hidden, new_message = jax.block_until_ready(
        lstm_ac_policy_forward(obs, hidden, message, noise, packed))

    pi_r, v_r, hid_r, msg_r = reference_forward(
        np.asarray(obs), np.asarray(hidden), np.asarray(message),
        np.asarray(noise), {k: np.asarray(w) for k, w in params.items()})

    np.testing.assert_allclose(np.asarray(pi), pi_r, rtol=5e-2, atol=5e-2)
    np.testing.assert_allclose(np.asarray(v), v_r, rtol=5e-2, atol=5e-2)
    np.testing.assert_allclose(np.asarray(new_hidden), hid_r, rtol=5e-2, atol=5e-2)
    np.testing.assert_allclose(np.asarray(new_message), msg_r, rtol=5e-2, atol=5e-2)

    print("KERNEL_OK")
</pallas_src>

<mosaic_0001>
module attributes {stable_mosaic.version = 11 : i64} {
  func.func @_lstm_ac_policy_kernel(%arg0: memref<3x128xf32, #tpu.memory_space<vmem>>, %arg1: memref<32x768xbf16, #tpu.memory_space<vmem>>, %arg2: memref<640x256xbf16, #tpu.memory_space<vmem>>, %arg3: memref<128x256xbf16, #tpu.memory_space<vmem>>, %arg4: memref<2x768xf32, #tpu.memory_space<vmem>>, %arg5: memref<3x128xf32, #tpu.memory_space<vmem>>) attributes {dimension_semantics = [], scalar_prefetch = 0 : i64, scratch_operands = 0 : i64, tpu.core_type = #tpu.core_type<tc>} {
    %c0 = arith.constant 0 : index
    %c0_0 = arith.constant 0 : index
    %0 = vector.load %arg0[%c0, %c0_0] : memref<3x128xf32, #tpu.memory_space<vmem>>, vector<1x128xf32>
    %c1 = arith.constant 1 : index
    %c0_1 = arith.constant 0 : index
    %1 = vector.load %arg0[%c1, %c0_1] : memref<3x128xf32, #tpu.memory_space<vmem>>, vector<1x128xf32>
    %c2 = arith.constant 2 : index
    %c0_2 = arith.constant 0 : index
    %2 = vector.load %arg0[%c2, %c0_2] : memref<3x128xf32, #tpu.memory_space<vmem>>, vector<1x128xf32>
    %3 = vector.extract_strided_slice %0 {offsets = [0, 29], sizes = [1, 1], strides = [1, 1]} : vector<1x128xf32> to vector<1x1xf32>
    %c0_3 = arith.constant 0 : index
    %c0_4 = arith.constant 0 : index
    %4 = vector.load %arg4[%c0_3, %c0_4] : memref<2x768xf32, #tpu.memory_space<vmem>>, vector<1x768xf32>
    %c1_5 = arith.constant 1 : index
    %c0_6 = arith.constant 0 : index
    %5 = vector.load %arg4[%c1_5, %c0_6] : memref<2x768xf32, #tpu.memory_space<vmem>>, vector<1x256xf32>
    %c1_7 = arith.constant 1 : index
    %c256 = arith.constant 256 : index
    %6 = vector.load %arg4[%c1_7, %c256] : memref<2x768xf32, #tpu.memory_space<vmem>>, vector<1x256xf32>
    %c1_8 = arith.constant 1 : index
    %c512 = arith.constant 512 : index
    %7 = vector.load %arg4[%c1_8, %c512] : memref<2x768xf32, #tpu.memory_space<vmem>>, vector<1x64xf32>
    %c1_9 = arith.constant 1 : index
    %c640 = arith.constant 640 : index
    %8 = vector.load %arg4[%c1_9, %c640] : memref<2x768xf32, #tpu.memory_space<vmem>>, vector<1x128xf32>
    %9 = vector.extract_strided_slice %0 {offsets = [0, 0], sizes = [1, 32], strides = [1, 1]} : vector<1x128xf32> to vector<1x32xf32>
    %10 = arith.truncf %9 : vector<1x32xf32> to vector<1x32xbf16>
    %c0_10 = arith.constant 0 : index
    %c0_11 = arith.constant 0 : index
    %11 = vector.load %arg1[%c0_10, %c0_11] : memref<32x768xbf16, #tpu.memory_space<vmem>>, vector<32x768xbf16>
    %cst = arith.constant dense<0.000000e+00> : vector<1x768xf32>
    %12 = tpu.matmul %10, %11, %cst {dimension_numbers = #tpu.dot_dimension_numbers<[1], [0], [0], [1], [0, 0, 1, 1], [], []>} : vector<1x32xbf16>, vector<32x768xbf16>, vector<1x768xf32> -> vector<1x768xf32>
    %13 = arith.addf %12, %4 : vector<1x768xf32>
    %cst_12 = arith.constant 0.000000e+00 : f32
    %14 = vector.broadcast %cst_12 : f32 to vector<1x768xf32>
    %15 = arith.maximumf %13, %14 : vector<1x768xf32>
    %16 = vector.extract_strided_slice %15 {offsets = [0, 0], sizes = [1, 128], strides = [1, 1]} : vector<1x768xf32> to vector<1x128xf32>
    %17 = vector.extract_strided_slice %15 {offsets = [0, 128], sizes = [1, 128], strides = [1, 1]} : vector<1x768xf32> to vector<1x128xf32>
    %18 = arith.addf %16, %17 : vector<1x128xf32>
    %19 = vector.extract_strided_slice %15 {offsets = [0, 256], sizes = [1, 128], strides = [1, 1]} : vector<1x768xf32> to vector<1x128xf32>
    %20 = arith.addf %18, %19 : vector<1x128xf32>
    %21 = vector.extract_strided_slice %1 {offsets = [0, 0], sizes = [1, 64], strides = [1, 1]} : vector<1x128xf32> to vector<1x64xf32>
    %22 = tpu.concatenate %20, %21 in 1 : vector<1x128xf32>, vector<1x64xf32> -> vector<1x192xf32>
    %23 = vector.extract_strided_slice %15 {offsets = [0, 384], sizes = [1, 384], strides = [1, 1]} : vector<1x768xf32> to vector<1x384xf32>
    %24 = vector.extract_strided_slice %1 {offsets = [0, 64], sizes = [1, 64], strides = [1, 1]} : vector<1x128xf32> to vector<1x64xf32>
    %25 = tpu.concatenate %23, %24 in 1 : vector<1x384xf32>, vector<1x64xf32> -> vector<1x448xf32>
    %26 = arith.truncf %22 : vector<1x192xf32> to vector<1x192xbf16>
    %c0_13 = arith.constant 0 : index
    %c0_14 = arith.constant 0 : index
    %27 = vector.load %arg2[%c0_13, %c0_14] : memref<640x256xbf16, #tpu.memory_space<vmem>>, vector<192x256xbf16>
    %cst_15 = arith.constant dense<0.000000e+00> : vector<1x256xf32>
    %28 = tpu.matmul %26, %27, %cst_15 {dimension_numbers = #tpu.dot_dimension_numbers<[1], [0], [0], [1], [0, 0, 1, 1], [], []>} : vector<1x192xbf16>, vector<192x256xbf16>, vector<1x256xf32> -> vector<1x256xf32>
    %29 = arith.addf %28, %5 : vector<1x256xf32>
    %30 = arith.truncf %25 : vector<1x448xf32> to vector<1x448xbf16>
    %c192 = arith.constant 192 : index
    %c0_16 = arith.constant 0 : index
    %31 = vector.load %arg2[%c192, %c0_16] : memref<640x256xbf16, #tpu.memory_space<vmem>>, vector<448x256xbf16>
    %cst_17 = arith.constant dense<0.000000e+00> : vector<1x256xf32>
    %32 = tpu.matmul %30, %31, %cst_17 {dimension_numbers = #tpu.dot_dimension_numbers<[1], [0], [0], [1], [0, 0, 1, 1], [], []>} : vector<1x448xbf16>, vector<448x256xbf16>, vector<1x256xf32> -> vector<1x256xf32>
    %33 = arith.addf %32, %6 : vector<1x256xf32>
    %34 = vector.extract_strided_slice %29 {offsets = [0, 0], sizes = [1, 64], strides = [1, 1]} : vector<1x256xf32> to vector<1x64xf32>
    %35 = vector.extract_strided_slice %33 {offsets = [0, 0], sizes = [1, 64], strides = [1, 1]} : vector<1x256xf32> to vector<1x64xf32>
    %36 = tpu.concatenate %34, %35 in 1 : vector<1x64xf32>, vector<1x64xf32> -> vector<1x128xf32>
    %37 = arith.negf %36 : vector<1x128xf32>
    %38 = math.exp %37 : vector<1x128xf32>
    %cst_18 = arith.constant 1.000000e+00 : f32
    %39 = vector.broadcast %cst_18 : f32 to vector<1x128xf32>
    %40 = arith.addf %39, %38 : vector<1x128xf32>
    %41 = arith.divf %39, %40 : vector<1x128xf32>
    %42 = vector.extract_strided_slice %29 {offsets = [0, 64], sizes = [1, 64], strides = [1, 1]} : vector<1x256xf32> to vector<1x64xf32>
    %43 = vector.extract_strided_slice %33 {offsets = [0, 64], sizes = [1, 64], strides = [1, 1]} : vector<1x256xf32> to vector<1x64xf32>
    %44 = tpu.concatenate %42, %43 in 1 : vector<1x64xf32>, vector<1x64xf32> -> vector<1x128xf32>
    %45 = arith.negf %44 : vector<1x128xf32>
    %46 = math.exp %45 : vector<1x128xf32>
    %cst_19 = arith.constant 1.000000e+00 : f32
    %47 = vector.broadcast %cst_19 : f32 to vector<1x128xf32>
    %48 = arith.addf %47, %46 : vector<1x128xf32>
    %49 = arith.divf %47, %48 : vector<1x128xf32>
    %50 = vector.extract_strided_slice %29 {offsets = [0, 128], sizes = [1, 64], strides = [1, 1]} : vector<1x256xf32> to vector<1x64xf32>
    %51 = vector.extract_strided_slice %33 {offsets = [0, 128], sizes = [1, 64], strides = [1, 1]} : vector<1x256xf32> to vector<1x64xf32>
    %52 = tpu.concatenate %50, %51 in 1 : vector<1x64xf32>, vector<1x64xf32> -> vector<1x128xf32>
    %53 = math.tanh %52 : vector<1x128xf32>
    %54 = vector.extract_strided_slice %29 {offsets = [0, 192], sizes = [1, 64], strides = [1, 1]} : vector<1x256xf32> to vector<1x64xf32>
    %55 = vector.extract_strided_slice %33 {offsets = [0, 192], sizes = [1, 64], strides = [1, 1]} : vector<1x256xf32> to vector<1x64xf32>
    %56 = tpu.concatenate %54, %55 in 1 : vector<1x64xf32>, vector<1x64xf32> -> vector<1x128xf32>
    %57 = arith.negf %56 : vector<1x128xf32>
    %58 = math.exp %57 : vector<1x128xf32>
    %cst_20 = arith.constant 1.000000e+00 : f32
    %59 = vector.broadcast %cst_20 : f32 to vector<1x128xf32>
    %60 = arith.addf %59, %58 : vector<1x128xf32>
    %61 = arith.divf %59, %60 : vector<1x128xf32>
    %62 = arith.mulf %49, %2 : vector<1x128xf32>
    %63 = arith.mulf %41, %53 : vector<1x128xf32>
    %64 = arith.addf %62, %63 : vector<1x128xf32>
    %65 = math.tanh %64 : vector<1x128xf32>
    %66 = arith.mulf %61, %65 : vector<1x128xf32>
    %67 = arith.truncf %66 : vector<1x128xf32> to vector<1x128xbf16>
    %c0_21 = arith.constant 0 : index
    %c0_22 = arith.constant 0 : index
    %68 = vector.load %arg3[%c0_21, %c0_22] : memref<128x256xbf16, #tpu.memory_space<vmem>>, vector<128x64xbf16>
    %cst_23 = arith.constant dense<0.000000e+00> : vector<1x64xf32>
    %69 = tpu.matmul %67, %68, %cst_23 {dimension_numbers = #tpu.dot_dimension_numbers<[1], [0], [0], [1], [0, 0, 1, 1], [], []>} : vector<1x128xbf16>, vector<128x64xbf16>, vector<1x64xf32> -> vector<1x64xf32>
    %70 = arith.addf %69, %7 : vector<1x64xf32>
    %cst_24 = arith.constant 0.000000e+00 : f32
    %71 = vector.broadcast %cst_24 : f32 to vector<1x64xf32>
    %72 = arith.maximumf %70, %71 : vector<1x64xf32>
    %73 = vector.extract_strided_slice %66 {offsets = [0, 64], sizes = [1, 64], strides = [1, 1]} : vector<1x128xf32> to vector<1x64xf32>
    %74 = tpu.concatenate %72, %73 in 1 : vector<1x64xf32>, vector<1x64xf32> -> vector<1x128xf32>
    %75 = arith.truncf %74 : vector<1x128xf32> to vector<1x128xbf16>
    %c0_25 = arith.constant 0 : index
    %c128 = arith.constant 128 : index
    %76 = vector.load %arg3[%c0_25, %c128] : memref<128x256xbf16, #tpu.memory_space<vmem>>, vector<128x128xbf16>
    %cst_26 = arith.constant dense<0.000000e+00> : vector<1x128xf32>
    %77 = tpu.matmul %75, %76, %cst_26 {dimension_numbers = #tpu.dot_dimension_numbers<[1], [0], [0], [1], [0, 0, 1, 1], [], []>} : vector<1x128xbf16>, vector<128x128xbf16>, vector<1x128xf32> -> vector<1x128xf32>
    %78 = arith.addf %77, %8 : vector<1x128xf32>
    %79 = vector.extract_strided_slice %78 {offsets = [0, 4], sizes = [1, 1], strides = [1, 1]} : vector<1x128xf32> to vector<1x1xf32>
    %cst_27 = arith.constant 2.000000e+00 : f32
    %80 = vector.broadcast %cst_27 : f32 to vector<1x1xf32>
    %81 = arith.mulf %3, %80 : vector<1x1xf32>
    %82 = arith.addf %79, %81 : vector<1x1xf32>
    %83 = arith.negf %82 : vector<1x1xf32>
    %84 = math.exp %83 : vector<1x1xf32>
    %cst_28 = arith.constant 1.000000e+00 : f32
    %85 = vector.broadcast %cst_28 : f32 to vector<1x1xf32>
    %86 = arith.addf %85, %84 : vector<1x1xf32>
    %87 = arith.divf %85, %86 : vector<1x1xf32>
    %88 = vector.extract_strided_slice %78 {offsets = [0, 0], sizes = [1, 4], strides = [1, 1]} : vector<1x128xf32> to vector<1x4xf32>
    %89 = vector.extract_strided_slice %78 {offsets = [0, 5], sizes = [1, 1], strides = [1, 1]} : vector<1x128xf32> to vector<1x1xf32>
    %cst_29 = arith.constant 0.000000e+00 : f32
    %90 = vector.broadcast %cst_29 : f32 to vector<1x122xf32>
    %91 = tpu.concatenate %88, %89, %87, %90 in 1 : vector<1x4xf32>, vector<1x1xf32>, vector<1x1xf32>, vector<1x122xf32> -> vector<1x128xf32>
    %92 = tpu.concatenate %66, %64, %91 in 0 : vector<1x128xf32>, vector<1x128xf32>, vector<1x128xf32> -> vector<3x128xf32>
    %c0_30 = arith.constant 0 : index
    %c0_31 = arith.constant 0 : index
    %93 = vector.load %arg5[%c0_30, %c0_31] : memref<3x128xf32, #tpu.memory_space<vmem>>, vector<3x128xf32>
    tpu.vector_store %arg5[%c0_30, %c0_31], %92 {strides = array<i32>} : memref<3x128xf32, #tpu.memory_space<vmem>>, vector<3x128xf32>,
    return
  }
}

</mosaic_0001>

<bundles_post_ra>
// kernel: lstm_ac_policy_forward.1
= control target key start
LH: loop header
LB: loop body
LE: loop exit
PB: predicated region body
PF: predicated region fallthrough
CT: control target
= control target key end

     0   :  { %10 = vsyncpa [#allocation3], 0  ;;  %s2048_s0 = inlined_call_operand.vmem [shape: f32[3,128], index: 0, kind: input, shape index: {}]   ;;  %s2049_s1 = inlined_call_operand.hbm [shape: bf16[32,768], index: 1, kind: input, shape index: {}]   ;;  %s2050_s2 = inlined_call_operand.hbm [shape: bf16[640,256], index: 2, kind: input, shape index: {}]   ;;  %s2051_s3 = inlined_call_operand.hbm [shape: bf16[128,256], index: 3, kind: input, shape index: {}]   ;;  %s2052_s4 = inlined_call_operand.vmem [shape: f32[2,768], index: 4, kind: input, shape index: {}]   ;;  %s2053_s5 = inlined_call_operand.vmem [shape: f32[3,128], index: 5, kind: output, shape index: {}]  }
   0x1   :  { %11 = vsyncpa [#allocation5], 0  ;;  %s31_s20 = sshll.u32 %s2050_s2, 4  ;;  %s1878_s21 = smov [#allocation4]   ;;  %s32_s20 = int_to_ptr.hbm [resolvable:$true] %s31_s20 }
   0x2   :  { %s33_s22 = sshll.u32 %s1878_s21, 4  ;;  %s18_s25 = sshll.u32 %s2049_s1, 4  ;;  %s34_s22 = int_to_ptr.vmem [resolvable:$true] %s33_s22  ;;  %s19_s25 = int_to_ptr.hbm [resolvable:$true] %s18_s25 }
   0x3   :  { %s1879_s26 = smov 128   ;;  %s1880_s27 = smov 8  }
   0x4   :  { %39 = dma.hbm_to_vmem [thread:$0]  %s32_s20, 10240, %s34_s22, [#allocation5], %s1879_s26, %s1879_s26, %s1880_s27  }
   0x5   :  { %s1881_s28 = smov [#allocation2]   ;;  %s1882_s30 = smov 384  }
   0x6   :  { %s20_s29 = sshll.u32 %s1881_s28, 4  ;;  %s1883_s6 = smov 24   ;;  %s21_s29 = int_to_ptr.vmem [resolvable:$true] %s20_s29 }
   0x7   :  { %26 = dma.hbm_to_vmem [thread:$0]  %s19_s25, 1536, %s21_s29, [#allocation3], %s1882_s30, %s1882_s30, %s1883_s6  }
   0x8   :  { %s44_s8 = sshll.u32 %s2051_s3, 4  ;;  %s1884_s9 = smov [#allocation6]   ;;  %s45_s8 = int_to_ptr.hbm [resolvable:$true] %s44_s8 }
   0x9   :  { %s46_s10 = sshll.u32 %s1884_s9, 4  ;;  %s47_s10 = int_to_ptr.vmem [resolvable:$true] %s46_s10 }
   0xa   :  { %52 = dma.hbm_to_vmem [thread:$0]  %s45_s8, 2048, %s47_s10, [#allocation5], %s1879_s26, %s1879_s26, %s1880_s27  }
   0xb   :  { %1874 = dma.done.wait [#allocation3], 1536  }
   0xc   :  { %1875 = vsyncadd [#allocation3], 4294965760 }
   0xd   :  { %1876 = dma.done.wait [#allocation5], 12288  }
   0xe   :  { %1877 = vsyncadd [#allocation5], 4294955008  ;;  %v1242_v0 = vld [vmem:[#allocation2 + $0x30] sm:$0xf]  ;;  %v1671_v1 = vld [vmem:[#allocation2 + $0x44] sm:$0xf0] }
   0xf   :  { %v1668_v2 = vld [vmem:[#allocation2 + $0x34] sm:$0xf]  ;;  %v1243_v3 = vor.u32 %v1671_v1, %v1242_v0  ;;  %v1244_v4 = vld [vmem:[#allocation2 + $0x48] sm:$0xf0]  ;;  %v1250_v5 = vld [vmem:[#allocation2 + $0x38] sm:$0xf] }
  0x10   :  { %v1672_v6 = vld [vmem:[#allocation2 + $0x4c] sm:$0xf0]  ;;  %v1247_v7 = vor.u32 %v1668_v2, %v1244_v4  ;;  %v1669_v9 = vld [vmem:[#allocation2 + $0x3c] sm:$0xf]  ;;  %v1252_v10 = vld [vmem:[#allocation2 + $0x50] sm:$0xf0] }
  0x11   :  { %v1251_v8 = vor.u32 %v1672_v6, %v1250_v5  ;;  %v1218_v11 = vld [vmem:[#allocation2] sm:$0xf]  ;;  %174 = vmatpush.bf16.msra.mxu0 %v1243_v3  ;;  %v1255_v12 = vor.u32 %v1669_v9, %v1252_v10  ;;  %v1665_v13 = vld [vmem:[#allocation2 + $0x14] sm:$0xf0]  ;;  %v1662_v14 = vld [vmem:[#allocation2 + $0x4] sm:$0xf] }
  0x12   :  { %v1220_v15 = vld [vmem:[#allocation2 + $0x18] sm:$0xf0]  ;;  %187 = vmatpush.bf16.msra.mxu1 %v1247_v7  ;;  %v1219_v16 = vor.u32 %v1665_v13, %v1218_v11  ;;  %v1226_v18 = vld [vmem:[#allocation2 + $0x8] sm:$0xf]  ;;  %v1666_v19 = vld [vmem:[#allocation2 + $0x1c] sm:$0xf0] }
  0x13   :  { %200 = vmatpush.bf16.msra.mxu2 %v1251_v8  ;;  %v1223_v17 = vor.u32 %v1662_v14, %v1220_v15  ;;  %v1663_v20 = vld [vmem:[#allocation2 + $0xc] sm:$0xf]  ;;  %213 = vmatpush.bf16.msra.mxu3 %v1255_v12  ;;  %v1227_v21 = vor.u32 %v1666_v19, %v1226_v18  ;;  %v1228_v22 = vld [vmem:[#allocation2 + $0x20] sm:$0xf0]  ;;  %v68_v23 = vld [vmem:[%s2048_s0] sm:$0x1] }
  0x14   :  { %v1670_v24 = vld [vmem:[#allocation2 + $0x44] sm:$0xf]  ;;  %v1231_v25 = vor.u32 %v1663_v20, %v1228_v22  ;;  %v1931_v26 = vpack.c.bf16 %v68_v23, %v68_v23  ;;  %v1260_v27 = vld [vmem:[#allocation2 + $0x58] sm:$0xf0]  ;;  %v1258_v28 = vld [vmem:[#allocation2 + $0x40] sm:$0xf] }
  0x15   :  { %v1673_v29 = vld [vmem:[#allocation2 + $0x54] sm:$0xf0]  ;;  %175 = vmatpush.bf16.msra.mxu0 %v1219_v16  ;;  %vm164_vm0 = vcmask 261120   ;;  %v1263_v30 = vor.u32 %v1670_v24, %v1260_v27  ;;  %v1664_v31 = vld [vmem:[#allocation2 + $0x14] sm:$0xf]  ;;  %s1885_s13 = smov 64  }
  0x16   :  { %188 = vmatpush.bf16.msra.mxu1 %v1223_v17  ;;  %v1259_v32 = vor.u32 %v1673_v29, %v1258_v28  ;;  %v1236_v33 = vld [vmem:[#allocation2 + $0x28] sm:$0xf0]  ;;  %v1936_v34 = vld [vmem:[%s2048_s0 + $0x1] sm:$0x1]  ;;  %v1360_v35 = vld [vmem:[#allocation4 + $0xb0] sm:$0xf] }
  0x17   :  { %201 = vmatpush.bf16.msra.mxu2 %v1227_v21  ;;  %214 = vmatpush.bf16.msra.mxu3 %v1231_v25  ;;  %v1234_v36 = vld [vmem:[#allocation2 + $0x10] sm:$0xf]  ;;  %v1667_v37 = vld [vmem:[#allocation2 + $0x24] sm:$0xf0]  ;;  %v1239_v38 = vor.u32 %v1664_v31, %v1236_v33  ;;  %v1697_v39 = vld [vmem:[#allocation4 + $0xb4] sm:$0xf0] }
  0x18   :  { %1264 = vmatmul.msk.bf16.vlgmr.msra.gmra.mxu0 %vm164_vm0, %v1931_v26  ;;  %255 = vrot.lane.b32.xlu0 %v1936_v34, %s1885_s13  ;;  %v1361_v40 = vor.u32 %v1697_v39, %v1360_v35  ;;  %v1352_v41 = vld [vmem:[#allocation4 + $0xa0] sm:$0xf]  ;;  %v1695_v42 = vld [vmem:[#allocation4 + $0xa4] sm:$0xf0]  ;;  %v1696_v43 = vld [vmem:[#allocation4 + $0xb4] sm:$0xf]  ;;  %v1235_v45 = vor.u32 %v1667_v37, %v1234_v36  ;;  %v1954_v37 = vpack.c.bf16 %v1936_v34, %v1936_v34 }
  0x19   :  { %1265 = vmatmul.msk.bf16.vlgmr.msra.gmra.mxu1 %vm164_vm0, %v1931_v26  ;;  %v1362_v44 = vld [vmem:[#allocation4 + $0xb8] sm:$0xf0]  ;;  %226 = vmatpush.bf16.msrb.mxu0 %v1259_v32  ;;  %v1694_v47 = vld [vmem:[#allocation4 + $0xa4] sm:$0xf]  ;;  %v1353_v48 = vor.u32 %v1695_v42, %v1352_v41  ;;  %v1354_v49 = vld [vmem:[#allocation4 + $0xa8] sm:$0xf0] }
  0x1a   :  { %239 = vmatpush.bf16.msrb.mxu1 %v1263_v30  ;;  %1266 = vmatmul.msk.bf16.vlgmr.msra.gmra.mxu2 %vm164_vm0, %v1931_v26  ;;  %v1365_v46 = vor.u32 %v1696_v43, %v1362_v44  ;;  %v1328_v50 = vld [vmem:[#allocation4 + $0x70] sm:$0xf]  ;;  %v1689_v51 = vld [vmem:[#allocation4 + $0x74] sm:$0xf0]  ;;  %v1357_v54 = vor.u32 %v1694_v47, %v1354_v49  ;;  %v1688_v56 = vld [vmem:[#allocation4 + $0x74] sm:$0xf] }
  0x1b   :  { %1267 = vmatmul.msk.bf16.vlgmr.msra.gmra.mxu3 %vm164_vm0, %v1931_v26  ;;  %v1344_v52 = vld [vmem:[#allocation4 + $0x90] sm:$0xf]  ;;  %v1693_v53 = vld [vmem:[#allocation4 + $0x94] sm:$0xf0]  ;;  %v1329_v55 = vor.u32 %v1689_v51, %v1328_v50  ;;  %v1330_v57 = vld [vmem:[#allocation4 + $0x78] sm:$0xf0] }
  0x1c   :  { %430 = vmatpush.bf16.msrb.mxu3 %v1361_v40  ;;  %v1692_v58 = vld [vmem:[#allocation4 + $0x94] sm:$0xf]  ;;  %v1346_v59 = vld [vmem:[#allocation4 + $0x98] sm:$0xf0]  ;;  %v1333_v60 = vor.u32 %v1688_v56, %v1330_v57  ;;  %v1320_v61 = vld [vmem:[#allocation4 + $0x60] sm:$0xf]  ;;  %v1345_v63 = vor.u32 %v1693_v53, %v1344_v52 }
  0x1d   :  { %227 = vmatpush.bf16.msrb.mxu0 %v1235_v45  ;;  %413 = vmatpush.bf16.msrb.mxu2 %v1329_v55  ;;  %v1687_v62 = vld [vmem:[#allocation4 + $0x64] sm:$0xf0]  ;;  %v1686_v1 = vld [vmem:[#allocation4 + $0x64] sm:$0xf]  ;;  %v1322_v2 = vld [vmem:[#allocation4 + $0x68] sm:$0xf0]  ;;  %v1349_v5 = vor.u32 %v1692_v58, %v1346_v59 }
  0x1e   :  { %240 = vmatpush.bf16.msrb.mxu1 %v1239_v38  ;;  %v1321_v0 = vor.u32 %v1687_v62, %v1320_v61  ;;  %v1336_v3 = vld [vmem:[#allocation4 + $0x80] sm:$0xf]  ;;  %v1691_v4 = vld [vmem:[#allocation4 + $0x84] sm:$0xf0]  ;;  %v1325_v6 = vor.u32 %v1686_v1, %v1322_v2  ;;  %v1312_v7 = vld [vmem:[#allocation4 + $0x50] sm:$0xf] }
  0x1f   :  { %v1426_v8 = vld [vmem:[#allocation4 + $0x130] sm:$0xf]  ;;  %v1713_v9 = vld [vmem:[#allocation4 + $0x134] sm:$0xf0]  ;;  %v1690_v11 = vld [vmem:[#allocation4 + $0x84] sm:$0xf]  ;;  %v1337_v15 = vor.u32 %v1691_v4, %v1336_v3 }
  0x20   :  { %431 = vmatpush.bf16.msrb.mxu3 %v1353_v48  ;;  %v1685_v10 = vld [vmem:[#allocation4 + $0x54] sm:$0xf0]  ;;  %v1338_v12 = vld [vmem:[#allocation4 + $0x88] sm:$0xf0]  ;;  %v1684_v14 = vld [vmem:[#allocation4 + $0x54] sm:$0xf]  ;;  %v1427_v19 = vor.u32 %v1713_v9, %v1426_v8 }
  0x21   :  { %439 = vmatpush.bf16.msra.mxu0 %v1333_v60  ;;  %414 = vmatpush.bf16.msrb.mxu2 %v1321_v0  ;;  %v1313_v13 = vor.u32 %v1685_v10, %v1312_v7  ;;  %v1314_v16 = vld [vmem:[#allocation4 + $0x58] sm:$0xf0]  ;;  %v1304_v17 = vld [vmem:[#allocation4 + $0x40] sm:$0xf]  ;;  %v1683_v18 = vld [vmem:[#allocation4 + $0x44] sm:$0xf0]  ;;  %v1341_v25 = vor.u32 %v1690_v11, %v1338_v12 }
  0x22   :  { %456 = vmatpush.bf16.msra.mxu1 %v1365_v46  ;;  %v1490_v20 = vld [vmem:[#allocation4 + $0x1b0] sm:$0xf]  ;;  %v1729_v21 = vld [vmem:[#allocation4 + $0x1b4] sm:$0xf0]  ;;  %v1418_v22 = vld [vmem:[#allocation4 + $0x120] sm:$0xf]  ;;  %v1317_v24 = vor.u32 %v1684_v14, %v1314_v16  ;;  %v1305_v27 = vor.u32 %v1683_v18, %v1304_v17 }
  0x23   :  { %v1711_v23 = vld [vmem:[#allocation4 + $0x124] sm:$0xf0]  ;;  %v1682_v28 = vld [vmem:[#allocation4 + $0x44] sm:$0xf]  ;;  %v1306_v29 = vld [vmem:[#allocation4 + $0x48] sm:$0xf0]  ;;  %v1491_v30 = vor.u32 %v1729_v21, %v1490_v20 }
  0x24   :  { %432 = vmatpush.bf16.msrb.mxu3 %v1345_v63  ;;  %v1296_v31 = vld [vmem:[#allocation4 + $0x30] sm:$0xf]  ;;  %v1681_v32 = vld [vmem:[#allocation4 + $0x34] sm:$0xf0]  ;;  %v1419_v33 = vor.u32 %v1711_v23, %v1418_v22  ;;  %v1482_v35 = vld [vmem:[#allocation4 + $0x1a0] sm:$0xf]  ;;  %v1309_v40 = vor.u32 %v1682_v28, %v1306_v29 }
  0x25   :  { %440 = vmatpush.bf16.msra.mxu0 %v1325_v6  ;;  %415 = vmatpush.bf16.msrb.mxu2 %v1313_v13  ;;  %v1727_v36 = vld [vmem:[#allocation4 + $0x1a4] sm:$0xf0]  ;;  %v1410_v38 = vld [vmem:[#allocation4 + $0x110] sm:$0xf]  ;;  %v1709_v39 = vld [vmem:[#allocation4 + $0x114] sm:$0xf0]  ;;  %v1297_v41 = vor.u32 %v1681_v32, %v1296_v31 }
  0x26   :  { %457 = vmatpush.bf16.msra.mxu1 %v1357_v54  ;;  %v1680_v42 = vld [vmem:[#allocation4 + $0x34] sm:$0xf]  ;;  %v1298_v43 = vld [vmem:[#allocation4 + $0x38] sm:$0xf0]  ;;  %v1483_v44 = vor.u32 %v1727_v36, %v1482_v35  ;;  %v1288_v45 = vld [vmem:[#allocation4 + $0x20] sm:$0xf]  ;;  %v1411_v47 = vor.u32 %v1709_v39, %v1410_v38 }
  0x27   :  { %v1679_v46 = vld [vmem:[#allocation4 + $0x24] sm:$0xf0]  ;;  %v1725_v48 = vld [vmem:[#allocation4 + $0x194] sm:$0xf0]  ;;  %vm409_vm1 = vcmask 523264   ;;  %v1301_v50 = vor.u32 %v1680_v42, %v1298_v43  ;;  %s1886_s24 = smov 103  }
  0x28   :  { %433 = vmatpush.bf16.msrb.mxu3 %v1337_v15  ;;  %1268 = vmatmul.msk.bf16.vlgmr.msrb.gmra.mxu0 %vm164_vm0, %v1931_v26  ;;  %v1402_v34 = vld [vmem:[#allocation4 + $0x100] sm:$0xf]  ;;  %v1707_v49 = vld [vmem:[#allocation4 + $0x104] sm:$0xf0]  ;;  %v1289_v51 = vor.u32 %v1679_v46, %v1288_v45  ;;  %v1678_v52 = vld [vmem:[#allocation4 + $0x24] sm:$0xf] }
  0x29   :  { %1269 = vmatmul.msk.bf16.vlgmr.msrb.gmra.mxu1 %vm164_vm0, %v1931_v26  ;;  %441 = vmatpush.bf16.msra.mxu0 %v1317_v24  ;;  %v1474_v26 = vld [vmem:[#allocation4 + $0x190] sm:$0xf]  ;;  %v1290_v53 = vld [vmem:[#allocation4 + $0x28] sm:$0xf0]  ;;  %v1677_v56 = vld [vmem:[#allocation4 + $0x14] sm:$0xf0]  ;;  %v1403_v57 = vor.u32 %v1707_v49, %v1402_v34 }
  0x2a   :  { %458 = vmatpush.bf16.msra.mxu1 %v1349_v5  ;;  %416 = vmatpush.bf16.msrb.mxu2 %v1305_v27  ;;  %v1475_v54 = vor.u32 %v1725_v48, %v1474_v26  ;;  %v1280_v55 = vld [vmem:[#allocation4 + $0x10] sm:$0xf]  ;;  %v1466_v58 = vld [vmem:[#allocation4 + $0x180] sm:$0xf]  ;;  %v1723_v59 = vld [vmem:[#allocation4 + $0x184] sm:$0xf0]  ;;  %v1293_v62 = vor.u32 %v1678_v52, %v1290_v53 }
  0x2b   :  { %1366 = vmatmul.msk.bf16.vlgmr.msrb.gmra.mxu3 %vm409_vm1, %v1954_v37  ;;  %v1394_v60 = vld [vmem:[#allocation4 + $0xf0] sm:$0xf]  ;;  %v1705_v61 = vld [vmem:[#allocation4 + $0xf4] sm:$0xf0]  ;;  %v1281_v63 = vor.u32 %v1677_v56, %v1280_v55  ;;  %v1676_v0 = vld [vmem:[#allocation4 + $0x14] sm:$0xf]  ;;  %v1467_v2 = vor.u32 %v1723_v59, %v1466_v58 }
  0x2c   :  { %813 = vmatpush.bf16.msra.mxu3 %v1427_v19  ;;  %v1282_v1 = vld [vmem:[#allocation4 + $0x18] sm:$0xf0]  ;;  %v1272_v3 = vld [vmem:[#allocation4] sm:$0xf]  ;;  %v1675_v4 = vld [vmem:[#allocation4 + $0x4] sm:$0xf0]  ;;  %v1395_v5 = vor.u32 %v1705_v61, %v1394_v60 }
  0x2d   :  { %442 = vmatpush.bf16.msra.mxu0 %v1309_v40  ;;  %v1458_v6 = vld [vmem:[#allocation4 + $0x170] sm:$0xf]  ;;  %v1721_v7 = vld [vmem:[#allocation4 + $0x174] sm:$0xf0]  ;;  %v1386_v8 = vld [vmem:[#allocation4 + $0xe0] sm:$0xf]  ;;  %v1285_v10 = vor.u32 %v1676_v0, %v1282_v1  ;;  %v1273_v11 = vor.u32 %v1675_v4, %v1272_v3 }
  0x2e   :  { %459 = vmatpush.bf16.msra.mxu1 %v1341_v25  ;;  %417 = vmatpush.bf16.msrb.mxu2 %v1297_v41  ;;  %v1703_v9 = vld [vmem:[#allocation4 + $0xe4] sm:$0xf0]  ;;  %v1459_v12 = vor.u32 %v1721_v7, %v1458_v6  ;;  %v1450_v14 = vld [vmem:[#allocation4 + $0x160] sm:$0xf]  ;;  %v1378_v16 = vld [vmem:[#allocation4 + $0xd0] sm:$0xf] }
  0x2f   :  { %v1387_v13 = vor.u32 %v1703_v9, %v1386_v8  ;;  %v1719_v15 = vld [vmem:[#allocation4 + $0x164] sm:$0xf0]  ;;  %v1701_v17 = vld [vmem:[#allocation4 + $0xd4] sm:$0xf0]  ;;  %v1370_v20 = vld [vmem:[#allocation4 + $0xc0] sm:$0xf] }
  0x30   :  { %814 = vmatpush.bf16.msra.mxu3 %v1419_v33  ;;  %v1451_v18 = vor.u32 %v1719_v15, %v1450_v14  ;;  %v1379_v19 = vor.u32 %v1701_v17, %v1378_v16  ;;  %v1699_v21 = vld [vmem:[#allocation4 + $0xc4] sm:$0xf0]  ;;  %v1712_v22 = vld [vmem:[#allocation4 + $0x134] sm:$0xf]  ;;  %v1428_v23 = vld [vmem:[#allocation4 + $0x138] sm:$0xf0] }
  0x31   :  { %443 = vmatpush.bf16.msra.mxu0 %v1301_v50  ;;  %v1371_v24 = vor.u32 %v1699_v21, %v1370_v20  ;;  %v1431_v25 = vor.u32 %v1712_v22, %v1428_v23  ;;  %v1554_v27 = vld [vmem:[#allocation4 + $0x230] sm:$0xf]  ;;  %v1745_v28 = vld [vmem:[#allocation4 + $0x234] sm:$0xf0]  ;;  %v1274_v31 = vld [vmem:[#allocation4 + $0x8] sm:$0xf0] }
  0x32   :  { %826 = vmatpush.bf16.msrb.mxu1 %v1491_v30  ;;  %418 = vmatpush.bf16.msrb.mxu2 %v1289_v51  ;;  %v1555_v29 = vor.u32 %v1745_v28, %v1554_v27  ;;  %v1674_v30 = vld [vmem:[#allocation4 + $0x4] sm:$0xf]  ;;  %v1420_v35 = vld [vmem:[#allocation4 + $0x128] sm:$0xf0]  ;;  %v1442_v36 = vld [vmem:[#allocation4 + $0x150] sm:$0xf] }
  0x33   :  { %v1710_v32 = vld [vmem:[#allocation4 + $0x124] sm:$0xf]  ;;  %v1277_v33 = vor.u32 %v1674_v30, %v1274_v31  ;;  %v1586_v40 = vld [vmem:[#allocation4 + $0x270] sm:$0xf]  ;;  %v1753_v41 = vld [vmem:[#allocation4 + $0x274] sm:$0xf0] }
  0x34   :  { %815 = vmatpush.bf16.msra.mxu3 %v1411_v47  ;;  %v1423_v38 = vor.u32 %v1710_v32, %v1420_v35  ;;  %v1587_v42 = vor.u32 %v1753_v41, %v1586_v40  ;;  %v1546_v43 = vld [vmem:[#allocation4 + $0x220] sm:$0xf]  ;;  %v1708_v46 = vld [vmem:[#allocation4 + $0x114] sm:$0xf]  ;;  %v1412_v47 = vld [vmem:[#allocation4 + $0x118] sm:$0xf0] }
  0x35   :  { %444 = vmatpush.bf16.msra.mxu0 %v1293_v62  ;;  %v1415_v26 = vor.u32 %v1708_v46, %v1412_v47  ;;  %v1434_v48 = vld [vmem:[#allocation4 + $0x140] sm:$0xf]  ;;  %v1715_v34 = vld [vmem:[#allocation4 + $0x144] sm:$0xf0]  ;;  %v1538_v53 = vld [vmem:[#allocation4 + $0x210] sm:$0xf] }
  0x36   :  { %827 = vmatpush.bf16.msrb.mxu1 %v1483_v44  ;;  %419 = vmatpush.bf16.msrb.mxu2 %v1281_v63  ;;  %v1743_v44 = vld [vmem:[#allocation4 + $0x224] sm:$0xf0]  ;;  %v1435_v49 = vor.u32 %v1715_v34, %v1434_v48  ;;  %v1578_v50 = vld [vmem:[#allocation4 + $0x260] sm:$0xf]  ;;  %v1744_v55 = vld [vmem:[#allocation4 + $0x234] sm:$0xf] }
  0x37   :  { %v1547_v45 = vor.u32 %v1743_v44, %v1546_v43  ;;  %v1751_v51 = vld [vmem:[#allocation4 + $0x264] sm:$0xf0]  ;;  %v1706_v58 = vld [vmem:[#allocation4 + $0x104] sm:$0xf]  ;;  %v1404_v59 = vld [vmem:[#allocation4 + $0x108] sm:$0xf0] }
  0x38   :  { %816 = vmatpush.bf16.msra.mxu3 %v1403_v57  ;;  %v1579_v52 = vor.u32 %v1751_v51, %v1578_v50  ;;  %v1556_v57 = vld [vmem:[#allocation4 + $0x238] sm:$0xf0]  ;;  %v1407_v61 = vor.u32 %v1706_v58, %v1404_v59  ;;  %v1570_v62 = vld [vmem:[#allocation4 + $0x250] sm:$0xf]  ;;  %v1749_v63 = vld [vmem:[#allocation4 + $0x254] sm:$0xf0] }
  0x39   :  { %445 = vmatpush.bf16.msra.mxu0 %v1285_v10  ;;  %1367 = vmatmul.msk.bf16.vlgmr.msra.gmra.mxu1 %vm409_vm1, %v1954_v37  ;;  %v1717_v37 = vld [vmem:[#allocation4 + $0x154] sm:$0xf0]  ;;  %v1559_v60 = vor.u32 %v1744_v55, %v1556_v57  ;;  %v1571_v0 = vor.u32 %v1749_v63, %v1570_v62  ;;  %v1530_v1 = vld [vmem:[#allocation4 + $0x200] sm:$0xf]  ;;  %v1742_v3 = vld [vmem:[#allocation4 + $0x224] sm:$0xf] }
  0x3a   :  { %828 = vmatpush.bf16.msrb.mxu1 %v1475_v54  ;;  %420 = vmatpush.bf16.msrb.mxu2 %v1273_v11  ;;  %v1443_v39 = vor.u32 %v1717_v37, %v1442_v36  ;;  %v1741_v54 = vld [vmem:[#allocation4 + $0x214] sm:$0xf0]  ;;  %v1704_v7 = vld [vmem:[#allocation4 + $0xf4] sm:$0xf]  ;;  %v1396_v8 = vld [vmem:[#allocation4 + $0xf8] sm:$0xf0] }
  0x3b   :  { %v1539_v56 = vor.u32 %v1741_v54, %v1538_v53  ;;  %v1399_v9 = vor.u32 %v1704_v7, %v1396_v8  ;;  %v1562_v10 = vld [vmem:[#allocation4 + $0x240] sm:$0xf]  ;;  %v1747_v11 = vld [vmem:[#allocation4 + $0x244] sm:$0xf0]  ;;  %v1737_v14 = vld [vmem:[#allocation4 + $0x1f4] sm:$0xf0] }
  0x3c   :  { %817 = vmatpush.bf16.msra.mxu3 %v1395_v5  ;;  %v1548_v5 = vld [vmem:[#allocation4 + $0x228] sm:$0xf0]  ;;  %v1740_v16 = vld [vmem:[#allocation4 + $0x214] sm:$0xf]  ;;  %v1540_v17 = vld [vmem:[#allocation4 + $0x218] sm:$0xf0] }
  0x3d   :  { %446 = vmatpush.bf16.msra.mxu0 %v1277_v33  ;;  %v1551_v6 = vor.u32 %v1742_v3, %v1548_v5  ;;  %v1543_v20 = vor.u32 %v1740_v16, %v1540_v17  ;;  %v1514_v22 = vld [vmem:[#allocation4 + $0x1e0] sm:$0xf]  ;;  %v1735_v23 = vld [vmem:[#allocation4 + $0x1e4] sm:$0xf0]  ;;  %v1532_v27 = vld [vmem:[#allocation4 + $0x208] sm:$0xf0] }
  0x3e   :  { %829 = vmatpush.bf16.msrb.mxu1 %v1467_v2  ;;  %839 = vmatpush.bf16.msra.mxu2 %v1555_v29  ;;  %v1739_v2 = vld [vmem:[#allocation4 + $0x204] sm:$0xf0]  ;;  %v1700_v29 = vld [vmem:[#allocation4 + $0xd4] sm:$0xf]  ;;  %v1380_v30 = vld [vmem:[#allocation4 + $0xd8] sm:$0xf0] }
  0x3f   :  { %v1531_v4 = vor.u32 %v1739_v2, %v1530_v1  ;;  %v1383_v31 = vor.u32 %v1700_v29, %v1380_v30  ;;  %v1506_v32 = vld [vmem:[#allocation4 + $0x1d0] sm:$0xf]  ;;  %v1733_v33 = vld [vmem:[#allocation4 + $0x1d4] sm:$0xf0]  ;;  %v1736_v36 = vld [vmem:[#allocation4 + $0x1f4] sm:$0xf] }
  0x40   :  { %818 = vmatpush.bf16.msra.mxu3 %v1387_v13  ;;  %v1522_v13 = vld [vmem:[#allocation4 + $0x1f0] sm:$0xf]  ;;  %v1507_v35 = vor.u32 %v1733_v33, %v1506_v32  ;;  %v1524_v37 = vld [vmem:[#allocation4 + $0x1f8] sm:$0xf0]  ;;  %v1372_v40 = vld [vmem:[#allocation4 + $0xc8] sm:$0xf0] }
  0x41   :  { %856 = vmatpush.bf16.msrb.mxu0 %v1587_v42  ;;  %v1523_v15 = vor.u32 %v1737_v14, %v1522_v13  ;;  %v1498_v41 = vld [vmem:[#allocation4 + $0x1c0] sm:$0xf]  ;;  %v1731_v44 = vld [vmem:[#allocation4 + $0x1c4] sm:$0xf0]  ;;  %v1734_v46 = vld [vmem:[#allocation4 + $0x1e4] sm:$0xf] }
  0x42   :  { %830 = vmatpush.bf16.msrb.mxu1 %v1459_v12  ;;  %840 = vmatpush.bf16.msra.mxu2 %v1547_v45  ;;  %v1563_v12 = vor.u32 %v1747_v11, %v1562_v10  ;;  %v1963_v42 = vld [vmem:[%s2052_s4] ss:$2 sm:$0x3f]  ;;  %v1499_v45 = vor.u32 %v1731_v44, %v1498_v41  ;;  %v1516_v47 = vld [vmem:[#allocation4 + $0x1e8] sm:$0xf0] }
  0x43   :  { %v152_v48 = vperm.slane %v1963_v42, 0  ;;  %v153_v34 = vperm.slane %v1963_v42, 1  ;;  %v1508_v51 = vld [vmem:[#allocation4 + $0x1d8] sm:$0xf0]  ;;  %v1500_v57 = vld [vmem:[#allocation4 + $0x1c8] sm:$0xf0] }
  0x44   :  { %819 = vmatpush.bf16.msra.mxu3 %v1379_v19  ;;  %v1388_v19 = vld [vmem:[#allocation4 + $0xe8] sm:$0xf0]  ;;  %v155_v62 = vperm.slane %v1963_v42, 3  ;;  %v1492_v7 = vld [vmem:[#allocation4 + $0x1b8] sm:$0xf0]  ;;  %v156_v14 = vperm.slane %v1963_v42, 4 }
  0x45   :  { %857 = vmatpush.bf16.msrb.mxu0 %v1579_v52  ;;  %v1588_v10 = vld [vmem:[#allocation4 + $0x278] sm:$0xf0]  ;;  %v1726_v16 = vld [vmem:[#allocation4 + $0x1a4] sm:$0xf]  ;;  %v1724_v30 = vld [vmem:[#allocation4 + $0x194] sm:$0xf] }
  0x46   :  { %831 = vmatpush.bf16.msrb.mxu1 %v1451_v18  ;;  %841 = vmatpush.bf16.msra.mxu2 %v1539_v56  ;;  %v1702_v18 = vld [vmem:[#allocation4 + $0xe4] sm:$0xf]  ;;  %v1476_v32 = vld [vmem:[#allocation4 + $0x198] sm:$0xf0]  ;;  %v1748_v33 = vld [vmem:[#allocation4 + $0x254] sm:$0xf] }
  0x47   :  { %v1391_v21 = vor.u32 %v1702_v18, %v1388_v19  ;;  %v1730_v56 = vld [vmem:[#allocation4 + $0x1c4] sm:$0xf]  ;;  %v1484_v19 = vld [vmem:[#allocation4 + $0x1a8] sm:$0xf0] }
  0x48   :  { %820 = vmatpush.bf16.msra.mxu3 %v1371_v24  ;;  %v1515_v24 = vor.u32 %v1735_v23, %v1514_v22  ;;  %v1487_v29 = vor.u32 %v1726_v16, %v1484_v19  ;;  %v1564_v44 = vld [vmem:[#allocation4 + $0x248] sm:$0xf0] }
  0x49   :  { %858 = vmatpush.bf16.msrb.mxu0 %v1571_v0 }
  0x4a   :  { %832 = vmatpush.bf16.msrb.mxu1 %v1443_v39  ;;  %842 = vmatpush.bf16.msra.mxu2 %v1531_v4  ;;  %v1698_v39 = vld [vmem:[#allocation4 + $0xc4] sm:$0xf] }
  0x4b   :  { %v1375_v43 = vor.u32 %v1698_v39, %v1372_v40  ;;  %v1479_v39 = vor.u32 %v1724_v30, %v1476_v32  ;;  %v1722_v40 = vld [vmem:[#allocation4 + $0x184] sm:$0xf] }
  0x4c   :  { %865 = vmatpush.bf16.msrb.mxu3 %v1431_v25  ;;  %v1738_v25 = vld [vmem:[#allocation4 + $0x204] sm:$0xf] }
  0x4d   :  { %859 = vmatpush.bf16.msrb.mxu0 %v1563_v12  ;;  %v1535_v28 = vor.u32 %v1738_v25, %v1532_v27 }
  0x4e   :  { %833 = vmatpush.bf16.msrb.mxu1 %v1435_v49  ;;  %843 = vmatpush.bf16.msra.mxu2 %v1523_v15  ;;  %v1732_v49 = vld [vmem:[#allocation4 + $0x1d4] sm:$0xf] }
  0x4f   :  { %v1511_v54 = vor.u32 %v1732_v49, %v1508_v51  ;;  %v1720_v49 = vld [vmem:[#allocation4 + $0x174] sm:$0xf] }
  0x50   :  { %866 = vmatpush.bf16.msrb.mxu3 %v1423_v38  ;;  %v1527_v38 = vor.u32 %v1736_v36, %v1524_v37 }
  0x52   :  { %891 = vmatpush.bf16.msra.mxu1 %v1559_v60  ;;  %844 = vmatpush.bf16.msra.mxu2 %v1515_v24  ;;  %v154_v60 = vperm.slane %v1963_v42, 2  ;;  %v157_v24 = vperm.slane %v1963_v42, 5  ;;  %v1468_v42 = vld [vmem:[#allocation4 + $0x188] sm:$0xf0] }
  0x54   :  { %867 = vmatpush.bf16.msrb.mxu3 %v1415_v26  ;;  %v1519_v26 = vor.u32 %v1734_v46, %v1516_v47 }
  0x56   :  { %892 = vmatpush.bf16.msra.mxu1 %v1551_v6  ;;  %845 = vmatpush.bf16.msra.mxu2 %v1507_v35  ;;  %v1728_v6 = vld [vmem:[#allocation4 + $0x1b4] sm:$0xf]  ;;  %v1572_v35 = vld [vmem:[#allocation4 + $0x258] sm:$0xf0] }
  0x57   :  { %v1495_v15 = vor.u32 %v1728_v6, %v1492_v7  ;;  %v1575_v41 = vor.u32 %v1748_v33, %v1572_v35 }
  0x58   :  { %868 = vmatpush.bf16.msrb.mxu3 %v1407_v61  ;;  %v1503_v61 = vor.u32 %v1730_v56, %v1500_v57  ;;  %v1452_v56 = vld [vmem:[#allocation4 + $0x168] sm:$0xf0] }
  0x5a   :  { %893 = vmatpush.bf16.msra.mxu1 %v1543_v20  ;;  %846 = vmatpush.bf16.msra.mxu2 %v1499_v45  ;;  %v1750_v20 = vld [vmem:[#allocation4 + $0x264] sm:$0xf] }
  0x5c   :  { %869 = vmatpush.bf16.msrb.mxu3 %v1399_v9  ;;  %v1752_v9 = vld [vmem:[#allocation4 + $0x274] sm:$0xf] }
  0x5d   :  { %v1591_v17 = vor.u32 %v1752_v9, %v1588_v10  ;;  %v1215_v10 = vld [vmem:[%s2052_s4 + $0x5] ss:$2 sm:$0x3] }
  0x5e   :  { %894 = vmatpush.bf16.msra.mxu1 %v1535_v28  ;;  %v807_v30 = vperm.slane %v1215_v10, 1 }
  0x60   :  { %870 = vmatpush.bf16.msrb.mxu3 %v1391_v21  ;;  %v1580_v21 = vld [vmem:[#allocation4 + $0x268] sm:$0xf0] }
  0x62   :  { %895 = vmatpush.bf16.msra.mxu1 %v1527_v38 }
  0x64   :  { %871 = vmatpush.bf16.msrb.mxu3 %v1383_v31  ;;  %v1583_v31 = vor.u32 %v1750_v20, %v1580_v21 }
  0x66   :  { %896 = vmatpush.bf16.msra.mxu1 %v1519_v26 }
  0x68   :  { %872 = vmatpush.bf16.msrb.mxu3 %v1375_v43  ;;  %v1746_v43 = vld [vmem:[#allocation4 + $0x244] sm:$0xf] }
  0x6a   :  { %897 = vmatpush.bf16.msra.mxu1 %v1511_v54 }
  0x6e   :  { %898 = vmatpush.bf16.msra.mxu1 %v1503_v61 }
  0x8a   :  { %v256_v26 = vpop.permute.xlu0 %255 }
  0x95   :  { %v177_v50 = vpop.f32.mrf.mxu0 }
  0x96   :  { %v178_v52 = vadd.f32 %v177_v50, %v152_v48  ;;  %v190_v53 = vpop.f32.mrf.mxu1  ;;  %v1471_v48 = vor.u32 %v1722_v40, %v1468_v42  ;;  %v1460_v50 = vld [vmem:[#allocation4 + $0x178] sm:$0xf0] }
  0x97   :  { %v191_v55 = vadd.f32 %v190_v53, %v153_v34  ;;  %v1567_v34 = vor.u32 %v1746_v43, %v1564_v44  ;;  %v468_v53 = vpack.c.bf16 %v256_v26, %v256_v26  ;;  %v1463_v54 = vor.u32 %v1720_v49, %v1460_v50  ;;  %v1627_v43 = vld [vmem:[#allocation6 + $0x70] sm:$0xf]  ;;  %v1761_v44 = vld [vmem:[#allocation6 + $0x74] sm:$0xf0]  ;;  %v1760_v26 = vld [vmem:[#allocation6 + $0x64] sm:$0xf0] }
  0x98   :  { %v246_v58 = vmax.f32 %v178_v52, 0.0  ;;  %v1619_v50 = vld [vmem:[#allocation6 + $0x50] sm:$0xf] }
  0x99   :  { %v247_v59 = vmax.f32 %v191_v55, 0.0  ;;  %v1718_v55 = vld [vmem:[#allocation4 + $0x164] sm:$0xf] }
  0x9a   :  { %v1455_v57 = vor.u32 %v1718_v55, %v1452_v56  ;;  %v1758_v55 = vld [vmem:[#allocation6 + $0x44] sm:$0xf0] }
  0x9b   :  { %v252_v0 = vadd.f32 %v247_v59, %v246_v58  ;;  %v1716_v59 = vld [vmem:[#allocation4 + $0x154] sm:$0xf] }
  0x9d   :  { %v203_v63 = vpop.f32.mrf.mxu2  ;;  %v179_v3 = vpop.f32.mrf.mxu0 }
  0x9e   :  { %v204_v1 = vadd.f32 %v203_v63, %v154_v60  ;;  %v216_v2 = vpop.f32.mrf.mxu3  ;;  %v192_v5 = vpop.f32.mrf.mxu1  ;;  %v1444_v60 = vld [vmem:[#allocation4 + $0x158] sm:$0xf0]  ;;  %v1714_v63 = vld [vmem:[#allocation4 + $0x144] sm:$0xf] }
  0x9f   :  { %v217_v4 = vadd.f32 %v216_v2, %v155_v62  ;;  %v1447_v62 = vor.u32 %v1716_v59, %v1444_v60 }
  0xa0   :  { %v248_v8 = vmax.f32 %v204_v1, 0.0 }
  0xa1   :  { %v249_v11 = vmax.f32 %v217_v4, 0.0  ;;  %v1214_v4 = vld [vmem:[%s2052_s4 + $0x1] ss:$2 sm:$0x3] }
  0xa2   :  { %v253_v12 = vadd.f32 %v252_v0, %v248_v8  ;;  %v1436_v0 = vld [vmem:[#allocation4 + $0x148] sm:$0xf0]  ;;  %v405_v5 = vperm.slane %v1214_v4, 0 }
  0xa3   :  { %v465_v13 = vpack.c.bf16 %v249_v11, %v249_v11  ;;  %v1439_v1 = vor.u32 %v1714_v63, %v1436_v0  ;;  %v1607_v0 = vld [vmem:[#allocation6 + $0x20] sm:$0xf] }
  0xa4   :  { %v258_v18 = vpack.c.bf16 %v253_v12, %v253_v12  ;;  %v406_v12 = vperm.slane %v1214_v4, 1 }
  0xa5   :  { %821 = vmatmul.bf16.vlgmr.msra.gmra.mxu3 %v465_v13  ;;  %v205_v22 = vpop.f32.mrf.mxu2  ;;  %v229_v23 = vpop.f32.mrf.mxu0 }
  0xa6   :  { %421 = vmatmul.bf16.vlgmr.msrb.gmra.mxu2 %v258_v18  ;;  %447 = vmatmul.bf16.vlgmr.msra.gmra.mxu0 %v258_v18  ;;  %v218_v25 = vpop.f32.mrf.mxu3  ;;  %v230_v27 = vadd.f32 %v229_v23, %v156_v14  ;;  %v242_v28 = vpop.f32.mrf.mxu1  ;;  %v806_v14 = vperm.slane %v1215_v10, 0 }
  0xa7   :  { %878 = vmatpush.bf16.msra.mxu0 %v1495_v15  ;;  %908 = vmatpush.bf16.msrb.mxu2 %v1591_v17  ;;  %v243_v37 = vadd.f32 %v242_v28, %v157_v24 }
  0xa8   :  { %v250_v36 = vmax.f32 %v230_v27, 0.0 }
  0xa9   :  { %v251_v45 = vmax.f32 %v243_v37, 0.0 }
  0xaa   :  { %v466_v38 = vpack.c.bf16 %v250_v36, %v250_v36 }
  0xab   :  { %879 = vmatpush.bf16.msra.mxu0 %v1487_v29  ;;  %909 = vmatpush.bf16.msrb.mxu2 %v1583_v31  ;;  %v467_v52 = vpack.c.bf16 %v251_v45, %v251_v45  ;;  %v1628_v45 = vor.u32 %v1761_v44, %v1627_v43 }
  0xac   :  { %834 = vmatmul.bf16.vlgmr.msrb.gmra.mxu1 %v466_v38 }
  0xad   :  { %v231_v46 = vpop.f32.mrf.mxu0 }
  0xae   :  { %v244_v47 = vpop.f32.mrf.mxu1  ;;  %v435_v51 = vpop.f32.mrf.mxu3 }
  0xaf   :  { %880 = vmatpush.bf16.msra.mxu0 %v1479_v39  ;;  %910 = vmatpush.bf16.msrb.mxu2 %v1575_v41  ;;  %v1623_v47 = vld [vmem:[#allocation6 + $0x60] sm:$0xf] }
  0xb3   :  { %881 = vmatpush.bf16.msra.mxu0 %v1471_v48  ;;  %911 = vmatpush.bf16.msrb.mxu2 %v1567_v34  ;;  %v1624_v34 = vor.u32 %v1760_v26, %v1623_v47 }
  0xb5   :  { %873 = vmatmul.bf16.vlgmr.msrb.gmra.mxu3 %v465_v13 }
  0xb6   :  { %847 = vmatmul.bf16.vlgmr.msra.gmra.mxu2 %v467_v52  ;;  %1592 = vmatmul.msk.bf16.vlgmr.msrb.gmra.mxu0 %vm409_vm1, %v468_v53  ;;  %v461_v58 = vpop.f32.mrf.mxu1  ;;  %v437_v61 = vpop.f32.mrf.mxu3 }
  0xb7   :  { %882 = vmatpush.bf16.msra.mxu0 %v1463_v54  ;;  %1065 = vmatpush.bf16.msra.mxu2 %v1628_v45  ;;  %v1615_v54 = vld [vmem:[#allocation6 + $0x40] sm:$0xf]  ;;  %v1611_v61 = vld [vmem:[#allocation6 + $0x30] sm:$0xf] }
  0xbb   :  { %883 = vmatpush.bf16.msra.mxu0 %v1455_v57  ;;  %1066 = vmatpush.bf16.msra.mxu2 %v1624_v34  ;;  %v1616_v57 = vor.u32 %v1758_v55, %v1615_v54 }
  0xbc   :  { %899 = vmatmul.bf16.vlgmr.msra.gmra.mxu1 %v467_v52 }
  0xbe   :  { %v463_v2 = vpop.f32.mrf.mxu1 }
  0xbf   :  { %884 = vmatpush.bf16.msra.mxu0 %v1447_v62  ;;  %v1757_v62 = vld [vmem:[#allocation6 + $0x34] sm:$0xf0] }
  0xc0   :  { %v1612_v63 = vor.u32 %v1757_v62, %v1611_v61  ;;  %v1764_v61 = vld [vmem:[#allocation6 + $0x28] sm:$0xf0] }
  0xc3   :  { %885 = vmatpush.bf16.msra.mxu0 %v1439_v1  ;;  %v1756_v1 = vld [vmem:[#allocation6 + $0x24] sm:$0xf0] }
  0xc6   :  { %886 = vmatmul.bf16.vlgmr.msra.gmra.mxu0 %v466_v38  ;;  %1593 = vmatmul.msk.bf16.vlgmr.msrb.gmra.mxu2 %vm409_vm1, %v468_v53 }
 0x123   :  { %v448_v3 = vpop.f32.mrf.mxu0 }
 0x124   :  { %v449_v15 = vadd.f32 %v448_v3, %v406_v12  ;;  %v1608_v3 = vor.u32 %v1756_v1, %v1607_v0  ;;  %v1754_v12 = vld [vmem:[#allocation6 + $0x4] sm:$0xf0] }
 0x126   :  { %v1983_v21 = vadd.f32 %v461_v58, %v449_v15 }
 0x128   :  { %v822_v6 = vpop.f32.mrf.mxu3 }
 0x129   :  { %v422_v7 = vpop.f32.mrf.mxu2  ;;  %v835_v9 = vpop.f32.mrf.mxu1  ;;  %v823_v18 = vadd.f32 %v822_v6, %v806_v14  ;;  %v1755_v6 = vld [vmem:[#allocation6 + $0x14] sm:$0xf0] }
 0x12a   :  { %v423_v8 = vadd.f32 %v422_v7, %v405_v5  ;;  %v1603_v5 = vld [vmem:[#allocation6 + $0x10] sm:$0xf] }
 0x12b   :  { %v450_v11 = vpop.f32.mrf.mxu0  ;;  %v836_v22 = vadd.f32 %v835_v9, %v823_v18  ;;  %v1604_v9 = vor.u32 %v1755_v6, %v1603_v5 }
 0x12c   :  { %v1979_v13 = vadd.f32 %v435_v51, %v423_v8  ;;  %v1759_v51 = vld [vmem:[#allocation6 + $0x54] sm:$0xf0]  ;;  %v1599_v11 = vld [vmem:[#allocation6] sm:$0xf] }
 0x12d   :  { %v1620_v52 = vor.u32 %v1759_v51, %v1619_v50  ;;  %v1765_v50 = vld [vmem:[#allocation6 + $0x38] sm:$0xf0] }
 0x12e   :  { %942 = vrot.lane.b32.xlu1 %v1979_v13, %s1885_s13 }
 0x12f   :  { %1067 = vmatpush.bf16.msra.mxu2 %v1620_v52  ;;  %v70_v52 = vld [vmem:[%s2048_s0 + $0x2] sm:$0x1] }
 0x130   :  { %v824_v16 = vpop.f32.mrf.mxu3 }
 0x131   :  { %v424_v17 = vpop.f32.mrf.mxu2  ;;  %v837_v19 = vpop.f32.mrf.mxu1  ;;  %v1600_v16 = vor.u32 %v1754_v12, %v1599_v11  ;;  %v1635_v11 = vld [vmem:[#allocation6 + $0x14] sm:$0xf]  ;;  %v1763_v12 = vld [vmem:[#allocation6 + $0x18] sm:$0xf0] }
 0x133   :  { %v861_v20 = vpop.f32.mrf.mxu0  ;;  %1068 = vmatpush.bf16.msra.mxu2 %v1616_v57 }
 0x136   :  { %972 = vrot.lane.b32.xlu1 %v1983_v21, %s1885_s13 }
 0x137   :  { %1069 = vmatpush.bf16.msra.mxu2 %v1612_v63 }
 0x138   :  { %v874_v23 = vpop.f32.mrf.mxu3 }
 0x139   :  { %v848_v24 = vpop.f32.mrf.mxu2  ;;  %v900_v27 = vpop.f32.mrf.mxu1  ;;  %v875_v33 = vadd.f32 %v874_v23, %v807_v30  ;;  %v1655_v23 = vld [vmem:[#allocation6 + $0x64] sm:$0xf]  ;;  %v1767_v30 = vld [vmem:[#allocation6 + $0x58] sm:$0xf0] }
 0x13a   :  { %v849_v25 = vadd.f32 %v848_v24, %v836_v22  ;;  %v1768_v24 = vld [vmem:[#allocation6 + $0x68] sm:$0xf0] }
 0x13b   :  { %v863_v28 = vpop.f32.mrf.mxu0  ;;  %1070 = vmatpush.bf16.msra.mxu2 %v1608_v3 }
 0x13c   :  { %v862_v29 = vadd.f32 %v861_v20, %v849_v25  ;;  %v1769_v20 = vld [vmem:[#allocation6 + $0x78] sm:$0xf0] }
 0x13e   :  { %918 = vrot.lane.b32.xlu0 %v862_v29, %s1885_s13 }
 0x13f   :  { %1071 = vmatpush.bf16.msra.mxu2 %v1604_v9 }
 0x140   :  { %v876_v31 = vpop.f32.mrf.mxu3 }
 0x141   :  { %v850_v32 = vpop.f32.mrf.mxu2  ;;  %v902_v35 = vpop.f32.mrf.mxu1 }
 0x143   :  { %v887_v36 = vpop.f32.mrf.mxu0  ;;  %1072 = vmatpush.bf16.msra.mxu2 %v1600_v16  ;;  %v1631_v16 = vld [vmem:[#allocation6 + $0x4] sm:$0xf] }
 0x144   :  { %v888_v37 = vadd.f32 %v887_v36, %v875_v33 }
 0x146   :  { %v901_v38 = vadd.f32 %v900_v27, %v888_v37  ;;  %v1656_v27 = vor.u32 %v1768_v24, %v1655_v23 }
 0x149   :  { %v913_v39 = vpop.f32.mrf.mxu2 }
 0x14a   :  { %v914_v40 = vadd.f32 %v913_v39, %v901_v38 }
 0x14b   :  { %v889_v41 = vpop.f32.mrf.mxu0 }
 0x14c   :  { %966 = vrot.lane.b32.xlu2 %v914_v40, %s1885_s13  ;;  %v1766_v41 = vld [vmem:[#allocation6 + $0x48] sm:$0xf0] }
 0x151   :  { %v915_v42 = vpop.f32.mrf.mxu2 }
 0x1a0   :  { %v943_v46 = vpop.permute.xlu1 %942 }
 0x1a1   :  { %v945_v48 = vsel %vm409_vm1, %v943_v46, %v862_v29  ;;  %v1651_v29 = vld [vmem:[#allocation6 + $0x54] sm:$0xf] }
 0x1a2   :  { %v1595_v49 = vmul.f32 -1.442695, %v945_v48  ;;  %v1652_v37 = vor.u32 %v1767_v30, %v1651_v29 }
 0x1a4   :  { %1781 = vpow2.f32 %v1595_v49  ;;  %v1643_v49 = vld [vmem:[#allocation6 + $0x34] sm:$0xf] }
 0x1a6   :  { %v967_v28 = vpop.permute.xlu2 %966 }
 0x1a7   :  { %v969_v35 = vsel %vm409_vm1, %v1983_v21, %v967_v28  ;;  %v77_v28 = vld [vmem:[%s2052_s4 + $0xb] sm:$0x1] }
 0x1a8   :  { %v973_v53 = vpop.permute.xlu1 %972 }
 0x1a9   :  { %v975_v56 = vsel %vm409_vm1, %v973_v53, %v914_v40  ;;  %v1647_v40 = vld [vmem:[#allocation6 + $0x44] sm:$0xf] }
 0x1aa   :  { %v1782_v58 = vpop.eup %1781  ;;  %v1596_v60 = vmul.f32 -1.442695, %v975_v56  ;;  %v1648_v26 = vor.u32 %v1766_v41, %v1647_v40  ;;  %v1644_v56 = vor.u32 %v1765_v50, %v1643_v49 }
 0x1ab   :  { %v1991_v59 = vadd.f32 1.0, %v1782_v58 }
 0x1ad   :  { %1783 = vrcp.f32 %v1991_v59  ;;  %vm955_vm3 = vweird.f32 %v1991_v59  ;;  %v961_v38 = vand.u32 2147483648, %v1991_v59  ;;  %v959_v43 = vand.u32 2147483647, %v1991_v59 }
 0x1ae   :  { %1785 = vpow2.f32 %v1596_v60  ;;  %v1639_v60 = vld [vmem:[#allocation6 + $0x24] sm:$0xf] }
 0x1af   :  { %v962_v48 = vor.u32 1.1754944e-38, %v961_v38  ;;  %vm960_vm6 = vcmp.eq.f32.partialorder %v959_v43, 8.507059e+37  ;;  %v1640_v1 = vor.u32 %v1764_v61, %v1639_v60 }
 0x1b0   :  { %v919_v2 = vpop.permute.xlu0 %918 }
 0x1b1   :  { %v921_v4 = vsel %vm409_vm1, %v1979_v13, %v919_v2  ;;  %v1659_v13 = vld [vmem:[#allocation6 + $0x74] sm:$0xf] }
 0x1b2   :  { %v1594_v7 = vmul.f32 -1.442695, %v921_v4  ;;  %v1660_v22 = vor.u32 %v1769_v20, %v1659_v13  ;;  %v76_v13 = vld [vmem:[%s2052_s4 + $0x9] sm:$0x1]  ;;  %s1888_s4 = smov 1  }
 0x1b3   :  { %v1784_v8 = vpop.eup %1783 }
 0x1b4   :  { %1787 = vpow2.f32 %v1594_v7  ;;  %v1786_v10 = vpop.eup %1785  ;;  %v951_v14 = vmul.f32 %v1784_v8, %v1991_v59  ;;  %1145 = vmatpush.bf16.msra.mxu3 %v1660_v22  ;;  %vm956_vm2 = vweird.f32 %v1784_v8 }
 0x1b5   :  { %v1997_v15 = vadd.f32 1.0, %v1786_v10  ;;  %vm2008_vm4 = vmor %vm955_vm3, %vm956_vm2  ;;  %vm1191_vm2 = vcmask 31744   ;;  %vm1193_vm3 = vcmask 39936  }
 0x1b6   :  { %v952_v18 = vsub.f32 1.0, %v951_v14  ;;  %v1636_v14 = vor.u32 %v1763_v12, %v1635_v11 }
 0x1b7   :  { %1789 = vrcp.f32 %v1997_v15  ;;  %v991_v3 = vand.u32 2147483648, %v1997_v15  ;;  %vm985_vm11 = vweird.f32 %v1997_v15  ;;  %v989_v4 = vand.u32 2147483647, %v1997_v15 }
 0x1b8   :  { %v953_v25 = vmul.f32 %v1784_v8, %v952_v18  ;;  %1146 = vmatpush.bf16.msra.mxu3 %v1656_v27  ;;  %v1801_v18 = vld [vmem:[%s2048_s0] sm:$0x1]  ;;  %s1887_s0 = smov 127  }
 0x1b9   :  { %v992_v6 = vor.u32 1.1754944e-38, %v991_v3  ;;  %vm990_vm13 = vcmp.eq.f32.partialorder %v989_v4, 8.507059e+37 }
 0x1ba   :  { %v1788_v17 = vpop.eup %1787  ;;  %v954_v33 = vadd.f32 %v1784_v8, %v953_v25 }
 0x1bb   :  { %v925_v19 = vadd.f32 1.0, %v1788_v17 }
 0x1bc   :  { %v958_v21 = vsel %vm2008_vm4, %v1784_v8, %v954_v33  ;;  %1147 = vmatpush.bf16.msra.mxu3 %v1652_v37  ;;  %vm1195_vm4 = vcmask 48128  }
 0x1bd   :  { %1791 = vrcp.f32 %v925_v19  ;;  %v2000_v31 = vpop.eup %1789  ;;  %v937_v45 = vand.u32 2147483648, %v925_v19  ;;  %v935_v47 = vand.u32 2147483647, %v925_v19  ;;  %vm931_vm7 = vweird.f32 %v925_v19 }
 0x1be   :  { %v981_v39 = vmul.f32 %v2000_v31, %v1997_v15  ;;  %1793 = vtanh.f32 %v969_v35  ;;  %v963_v53 = vsel %vm960_vm6, %v962_v48, %v958_v21  ;;  %vm986_vm10 = vweird.f32 %v2000_v31  ;;  %v1762_v15 = vld [vmem:[#allocation6 + $0x8] sm:$0xf0] }
 0x1bf   :  { %v938_v54 = vor.u32 1.1754944e-38, %v937_v45  ;;  %vm936_vm9 = vcmp.eq.f32.partialorder %v935_v47, 8.507059e+37  ;;  %v995_v62 = vmul.f32 %v963_v53, %v70_v52  ;;  %vm987_vm12 = vmor %vm985_vm11, %vm986_vm10  ;;  %v1632_v17 = vor.u32 %v1762_v15, %v1631_v16 }
 0x1c0   :  { %v982_v34 = vsub.f32 1.0, %v981_v39  ;;  %1148 = vmatpush.bf16.msra.mxu3 %v1648_v26  ;;  %vm1205_vm6 = vcmask 1041408  }
 0x1c2   :  { %v983_v58 = vmul.f32 %v2000_v31, %v982_v34 }
 0x1c3   :  { %v1792_v32 = vpop.eup %1791 }
 0x1c4   :  { %v927_v36 = vmul.f32 %v1792_v32, %v925_v19  ;;  %vm932_vm5 = vweird.f32 %v1792_v32  ;;  %v1794_v57 = vpop.eup %1793  ;;  %1149 = vmatpush.bf16.msra.mxu3 %v1644_v56  ;;  %v984_v2 = vadd.f32 %v2000_v31, %v983_v58  ;;  %v1158_v19 = vmul.f32 2.0, %v1801_v18 }
 0x1c5   :  { %vm933_vm8 = vmor %vm931_vm7, %vm932_vm5  ;;  %vm1203_vm5 = vcmask 1040384  }
 0x1c6   :  { %v928_v44 = vsub.f32 1.0, %v927_v36  ;;  %v988_v5 = vsel %vm987_vm12, %v2000_v31, %v984_v2  ;;  %1160 = vrot.lane.b32.xlu2 %v1158_v19, %s1886_s24 }
 0x1c7   :  { %v993_v8 = vsel %vm990_vm13, %v992_v6, %v988_v5 }
 0x1c8   :  { %v929_v46 = vmul.f32 %v1792_v32, %v928_v44  ;;  %1150 = vmatpush.bf16.msra.mxu3 %v1640_v1 }
 0x1ca   :  { %v930_v51 = vadd.f32 %v1792_v32, %v929_v46 }
 0x1cc   :  { %v934_v55 = vsel %vm933_vm8, %v1792_v32, %v930_v51  ;;  %1151 = vmatpush.bf16.msra.mxu3 %v1636_v14 }
 0x1cd   :  { %v939_v59 = vsel %vm936_vm9, %v938_v54, %v934_v55 }
 0x1ce   :  { %v996_v63 = vmul.f32 %v1794_v57, %v939_v59 }
 0x1d0   :  { %v2019_v0 = vadd.f32 %v996_v63, %v995_v62  ;;  %1152 = vmatpush.bf16.msra.mxu3 %v1632_v17 }
 0x1d2   :  { %1795 = vtanh.f32 %v2019_v0  ;;  %v1198_v49 = vrot.slane %v2019_v0, 7 }
 0x1d8   :  { %v1796_v7 = vpop.eup %1795 }
 0x1d9   :  { %v2028_v9 = vmul.f32 %v1796_v7, %v993_v8 }
 0x1db   :  { %v1000_v10 = vpack.c.bf16 %v2028_v9, %v2028_v9  ;;  %v1204_v52 = vsel %vm1203_vm5, %v2028_v9, %v1198_v49 }
 0x1dd   :  { %1073 = vmatmul.bf16.vlgmr.msra.gmra.mxu2 %v1000_v10 }
 0x220   :  { %v1161_v30 = vpop.permute.xlu2 %1160 }
 0x260   :  { %v1074_v20 = vpop.f32.mrf.mxu2 }
 0x261   :  { %v1075_v22 = vadd.f32 %v1074_v20, %v76_v13 }
 0x263   :  { %v1078_v23 = vmax.f32 %v1075_v22, 0.0 }
 0x265   :  { %v1079_v24 = vsel %vm409_vm1, %v1078_v23, %v2028_v9 }
 0x266   :  { %v1080_v25 = vpack.c.bf16 %v1079_v24, %v1079_v24 }
 0x268   :  { %v1076_v27 = vpop.f32.mrf.mxu2  ;;  %1153 = vmatmul.bf16.vlgmr.msra.gmra.mxu3 %v1080_v25 }
 0x2eb   :  { %v1154_v29 = vpop.f32.mrf.mxu3 }
 0x2ec   :  { %v1155_v31 = vadd.f32 %v1154_v29, %v77_v28 }
 0x2ee   :  { %v1163_v32 = vadd.f32 %v1161_v30, %v1155_v31  ;;  %1184 = vrot.lane.b32.xlu0 %v1155_v31, %s1887_s0 }
 0x2f0   :  { %v1661_v33 = vmul.f32 -1.442695, %v1163_v32 }
 0x2f2   :  { %1797 = vpow2.f32 %v1661_v33 }
 0x2f3   :  { %v1156_v35 = vpop.f32.mrf.mxu3 }
 0x2f8   :  { %v1798_v36 = vpop.eup %1797 }
 0x2f9   :  { %v1167_v37 = vadd.f32 1.0, %v1798_v36 }
 0x2fb   :  { %1799 = vrcp.f32 %v1167_v37  ;;  %v1179_v41 = vand.u32 2147483648, %v1167_v37  ;;  %v1177_v43 = vand.u32 2147483647, %v1167_v37  ;;  %vm1173_vm15 = vweird.f32 %v1167_v37 }
 0x2fd   :  { %v1180_v21 = vor.u32 1.1754944e-38, %v1179_v41  ;;  %vm1178_vm1 = vcmp.eq.f32.partialorder %v1177_v43, 8.507059e+37 }
 0x301   :  { %v1800_v38 = vpop.eup %1799 }
 0x302   :  { %v1169_v39 = vmul.f32 %v1800_v38, %v1167_v37  ;;  %vm1174_vm14 = vweird.f32 %v1800_v38 }
 0x303   :  { %vm1175_vm0 = vmor %vm1173_vm15, %vm1174_vm14 }
 0x304   :  { %v1170_v40 = vsub.f32 1.0, %v1169_v39 }
 0x306   :  { %v1171_v42 = vmul.f32 %v1800_v38, %v1170_v40 }
 0x308   :  { %v1172_v44 = vadd.f32 %v1800_v38, %v1171_v42 }
 0x30a   :  { %v1176_v45 = vsel %vm1175_vm0, %v1800_v38, %v1172_v44 }
 0x30b   :  { %v1181_v46 = vsel %vm1178_vm1, %v1180_v21, %v1176_v45 }
 0x30c   :  { %1188 = vrot.lane.b32.xlu1 %v1181_v46, %s1888_s4 }
 0x360   :  { %v1185_v47 = vpop.permute.xlu0 %1184 }
 0x361   :  { %v1192_v26 = vsel %vm1191_vm2, %v1155_v31, %v1185_v47 }
 0x37e   :  { %v1189_v48 = vpop.permute.xlu1 %1188 }
 0x37f   :  { %v1194_v34 = vsel %vm1193_vm3, %v1192_v26, %v1189_v48 }
 0x380   :  { %v1196_v50 = vsel %vm1195_vm4, %v1194_v34, 0.0 }
 0x381   :  { %v1201_v51 = vrot.slane %v1196_v50, 6 }
 0x383   :  { %v1206_v53 = vsel %vm1205_vm6, %v1204_v52, %v1201_v51 }
 0x384   :  { %1207 = vst [vmem:[%s2053_s5] sm:$0x7] %v1206_v53 }
 0x385   :  { %1212 = vsyncpa [#allocation3], 1 }
 0x386   :  { %1213 = vsyncpa [#allocation5], 1 }

</bundles_post_ra>
